<compile_context>
chip_gen: v7x
topology: tpu7x:2x2x1
jax: 0.10.0
libtpu: 0.0.40
codegen_flags: <defaults>
</compile_context>

<pallas_src>
import functools

import numpy as np
import jax
import jax.numpy as jnp
from jax.experimental import pallas as pl
from jax.experimental.pallas import tpu as pltpu

EPS = 1e-5   # PyTorch BatchNorm2d default eps
LANE = 128   # TPU lane width


# --------------------------------------------------------------------------
# Kernel
# --------------------------------------------------------------------------
def _residual_kernel(x_ref, w1_ref, w2_ref, w3_ref, ch_ref, out_ref,
                     *, N, H, W, Cout):
    NH = N * H
    WCo = W * Cout
    inv_cnt = 1.0 / float(N * H * W)
    bf16 = jnp.bfloat16

    # Vertical-tap validity masks, generated in-kernel (VPU iota + cmp).
    h = jax.lax.broadcasted_iota(jnp.int32, (NH, 1), 0) % H
    m_up = (h > 0).astype(jnp.float32)       # tap reads row h-1
    m_dn = (h < H - 1).astype(jnp.float32)   # tap reads row h+1

    def conv3x3(y, w_ref):
        # Vertical taps via sublane rolls (XLU slot), masked at image
        # boundaries; horizontal taps + zero padding are folded into the
        # banded weights.  Taps are stacked along K -> ONE MXU matmul per
        # conv and a single bf16 cast of the stacked lhs.
        up = pltpu.roll(y, 1, axis=0) * m_up        # row h-1
        dn = pltpu.roll(y, NH - 1, axis=0) * m_dn   # row h+1
        lhs = jnp.concatenate([up, y, dn], axis=1).astype(bf16)
        return jnp.dot(lhs, w_ref[...], preferred_element_type=jnp.float32)

    def chan_sum(v):
        # Lane tree-reduction over the W groups (stride Cout) via XLU rolls;
        # result is already broadcast back across lanes in channel pattern.
        s = WCo // 2
        while s >= Cout:
            v = v + pltpu.roll(v, s, axis=1)
            s //= 2
        return v

    def batchnorm(a, g, b):
        mean = chan_sum(jnp.sum(a, axis=0, keepdims=True)) * inv_cnt
        d = a - mean
        var = chan_sum(jnp.sum(d * d, axis=0, keepdims=True)) * inv_cnt
        return d * (g * jax.lax.rsqrt(var + EPS)) + b

    x = x_ref[...]                                   # (NH, W*Cin_pad) f32
    ch = ch_ref[...]                                 # (8, W*Cout) packed rows
    b3, g1, bb1 = ch[0:1, :], ch[1:2, :], ch[2:3, :]
    g2, bb2 = ch[3:4, :], ch[4:5, :]

    # conv1 -> bn1 -> relu
    y = jnp.maximum(batchnorm(conv3x3(x, w1_ref), g1, bb1), 0.0)
    # conv2 -> bn2
    y = batchnorm(conv3x3(y, w2_ref), g2, bb2)
    # skip path: 1x1 conv as block-diagonal matmul (bias kept, no BN here)
    skip = jnp.dot(x.astype(bf16), w3_ref[...],
                   preferred_element_type=jnp.float32) + b3
    # residual add + final relu; 128-lane-dense unmasked store
    out_ref[...] = jnp.maximum(y + skip, 0.0)


# --------------------------------------------------------------------------
# One-time weight preparation (run once per parameter update, NOT per forward)
# --------------------------------------------------------------------------
def _banded_conv_weights(wt, W):
    """OIHW (Co, Ci, 3, 3) conv weight -> K-stacked banded (3*W*Ci, W*Co):
    horizontal taps + horizontal zero padding folded in; vertical taps stacked
    along K in [up(h-1), center(h), down(h+1)] order."""
    hi = jax.lax.Precision.HIGHEST
    Co, Ci = wt.shape[0], wt.shape[1]
    sel = np.zeros((3, W, W), np.float32)          # (kx, wi, wo)
    for kx in range(3):
        for wo in range(W):
            wi = wo + kx - 1
            if 0 <= wi < W:
                sel[kx, wi, wo] = 1.0
    # out[ky, wi, ci, wo, co] = sum_kx sel[kx, wi, wo] * wt[co, ci, ky, kx]
    wfull = jnp.einsum('xio,cdyx->yidoc', jnp.asarray(sel),
                       jnp.asarray(wt, jnp.float32), precision=hi)
    return wfull.reshape(3 * W * Ci, W * Co)


def _blockdiag_1x1_weight(wt, W):
    """OIHW (Co, Ci, 1, 1) 1x1 conv weight -> block-diagonal (W*Ci, W*Co)."""
    hi = jax.lax.Precision.HIGHEST
    Co, Ci = wt.shape[0], wt.shape[1]
    w = jnp.einsum('io,cd->idoc', jnp.eye(W, dtype=jnp.float32),
                   jnp.asarray(wt[:, :, 0, 0], jnp.float32), precision=hi)
    return w.reshape(W * Ci, W * Co)


def _lane_row(v, W):
    """Per-channel (C,) vector -> (1, W*C) lane row (w-major, c-minor)."""
    return jnp.tile(jnp.asarray(v, jnp.float32).reshape(1, -1), (1, W))


def _pad_in_channels(wt, Ci_pad):
    """Zero-pad the input-channel axis of an OIHW weight to Ci_pad."""
    Ci = wt.shape[1]
    if Ci_pad == Ci:
        return jnp.asarray(wt, jnp.float32)
    pad = jnp.zeros((wt.shape[0], Ci_pad - Ci) + wt.shape[2:], jnp.float32)
    return jnp.concatenate([jnp.asarray(wt, jnp.float32), pad], axis=1)


def prepare_params(params, W):
    """Build kernel-ready operands.  Call once per parameter update."""
    Cout, Cin = params["w1"].shape[0], params["w1"].shape[1]
    assert (W & (W - 1)) == 0, "lane tree-reduction assumes W is a power of two"
    assert (W * Cout) % LANE == 0, "output lanes must be a multiple of 128"
    # Pad input channels so W*Cin is a multiple of 128 lanes (aligned concat,
    # lane-dense input loads/rolls).
    Cin_pad = (pl.cdiv(W * Cin, LANE) * LANE) // W
    assert (pl.cdiv(W * Cin, LANE) * LANE) % W == 0

    bf16 = jnp.bfloat16
    w1p = _pad_in_channels(params["w1"], Cin_pad)        # (Cout, Cin_pad, 3, 3)
    w3p = _pad_in_channels(params["w3"], Cin_pad)        # (Cout, Cin_pad, 1, 1)
    # Pack the five per-channel rows into one (8, W*Cout) f32 operand.
    ch = jnp.concatenate([
        _lane_row(params["b3"], W),
        _lane_row(params["g1"], W), _lane_row(params["beta1"], W),
        _lane_row(params["g2"], W), _lane_row(params["beta2"], W),
        jnp.zeros((3, W * Cout), jnp.float32)], axis=0)
    # conv biases b1/b2 are cancelled exactly by training-mode BN mean
    # subtraction -> dropped.
    return {
        "w1": _banded_conv_weights(w1p, W).astype(bf16),          # (3*W*Cin_pad, W*Cout)
        "w2": _banded_conv_weights(params["w2"], W).astype(bf16), # (3*W*Cout,   W*Cout)
        "w3": _blockdiag_1x1_weight(w3p, W).astype(bf16),         # (W*Cin_pad,  W*Cout)
        "ch": ch,                                                 # (8, W*Cout) f32
    }


# --------------------------------------------------------------------------
# Jitted end-to-end forward (layout plumbing fuses into the surrounding XLA)
# --------------------------------------------------------------------------
@jax.jit
def residual_forward(x_nchw, prepped):
    """x_nchw: (N, Cin, H, W) float32. Returns (N, Cout, H, W) float32."""
    N, Cin, H, W = x_nchw.shape
    Cout = prepped["ch"].shape[1] // W
    Cin_pad = prepped["w3"].shape[0] // W
    NH = N * H

    # NCHW -> lane-dense (N*H, W*Cin_pad): row = n*H + h, lane = w*Cin_pad + c
    x_nhwc = jnp.transpose(x_nchw, (0, 2, 3, 1)).astype(jnp.float32)
    if Cin_pad != Cin:
        x_nhwc = jnp.pad(x_nhwc, ((0, 0), (0, 0), (0, 0), (0, Cin_pad - Cin)))
    x2d = x_nhwc.reshape(NH, W * Cin_pad)

    kernel = functools.partial(_residual_kernel, N=N, H=H, W=W, Cout=Cout)
    vmem = pl.BlockSpec(memory_space=pltpu.MemorySpace.VMEM)

    out2d = pl.pallas_call(
        kernel,
        out_shape=jax.ShapeDtypeStruct((NH, W * Cout), jnp.float32),
        in_specs=[vmem] * 5,
        out_specs=vmem,
    )(x2d, prepped["w1"], prepped["w2"], prepped["w3"], prepped["ch"])

    # lane-dense (N*H, W*Cout) -> NCHW  (in a multi-block net, keep the
    # lane-dense layout between blocks and skip this transpose).
    return jnp.transpose(out2d.reshape(N, H, W, Cout), (0, 3, 1, 2))


# --------------------------------------------------------------------------
# Pure-JAX reference (training-mode BN, matches the PyTorch forward)
# --------------------------------------------------------------------------
def reference_forward(x, p):
    hi = jax.lax.Precision.HIGHEST

    def conv(x, w, b, pad):
        y = jax.lax.conv_general_dilated(
            x, w, (1, 1), [(pad, pad), (pad, pad)],
            dimension_numbers=("NCHW", "OIHW", "NCHW"), precision=hi)
        return y + b[None, :, None, None]

    def bn(x, g, b):
        m = x.mean(axis=(0, 2, 3), keepdims=True)
        v = ((x - m) ** 2).mean(axis=(0, 2, 3), keepdims=True)
        return (x - m) / jnp.sqrt(v + EPS) * g[None, :, None, None] + b[None, :, None, None]

    y = jax.nn.relu(bn(conv(x, p["w1"], p["b1"], 1), p["g1"], p["beta1"]))
    y = bn(conv(y, p["w2"], p["b2"], 1), p["g2"], p["beta2"])
    xs = conv(x, p["w3"], p["b3"], 0)
    return jax.nn.relu(y + xs)


if __name__ == "__main__":
    # Residual(input_channels=4, num_channels=8, use_1x1conv=True, strides=1)
    N, Cin, Cout, H, W = 2, 4, 8, 16, 16

    key = jax.random.PRNGKey(0)
    ks = jax.random.split(key, 10)
    params = {
        "w1": 0.2 * jax.random.normal(ks[0], (Cout, Cin, 3, 3), jnp.float32),
        "b1": 0.1 * jax.random.normal(ks[1], (Cout,), jnp.float32),
        "w2": 0.2 * jax.random.normal(ks[2], (Cout, Cout, 3, 3), jnp.float32),
        "b2": 0.1 * jax.random.normal(ks[3], (Cout,), jnp.float32),
        "w3": 0.2 * jax.random.normal(ks[4], (Cout, Cin, 1, 1), jnp.float32),
        "b3": 0.1 * jax.random.normal(ks[5], (Cout,), jnp.float32),
        "g1": 1.0 + 0.1 * jax.random.normal(ks[6], (Cout,), jnp.float32),
        "beta1": 0.1 * jax.random.normal(ks[7], (Cout,), jnp.float32),
        "g2": 1.0 + 0.1 * jax.random.normal(ks[8], (Cout,), jnp.float32),
        "beta2": 0.1 * jax.random.normal(ks[9], (Cout,), jnp.float32),
    }

    # One-time weight preparation (per parameter update, not per forward).
    prepped = jax.tree_util.tree_map(jax.block_until_ready, prepare_params(params, W))

    x = jax.random.normal(jax.random.PRNGKey(42), (N, Cin, H, W), jnp.float32)

    out = jax.block_until_ready(residual_forward(x, prepped))
    ref = jax.block_until_ready(reference_forward(x, params))

    assert out.shape == (N, Cout, H, W), out.shape
    # Kernel uses bf16 matmul operands with f32 accumulation (native MXU path);
    # compared against an f32-HIGHEST reference -> allow bf16-level tolerance.
    err = float(jnp.max(jnp.abs(out - ref)))
    assert bool(jnp.allclose(out, ref, atol=2e-2, rtol=2e-2)), (
        "max abs err = %g" % err)

    print("KERNEL_OK")
</pallas_src>

<mosaic_0001>
module attributes {stable_mosaic.version = 11 : i64} {
  func.func @_residual_kernel(%arg0: memref<32x128xf32, #tpu.memory_space<vmem>>, %arg1: memref<384x128xbf16, #tpu.memory_space<vmem>>, %arg2: memref<384x128xbf16, #tpu.memory_space<vmem>>, %arg3: memref<128x128xbf16, #tpu.memory_space<vmem>>, %arg4: memref<8x128xf32, #tpu.memory_space<vmem>>, %arg5: memref<32x128xf32, #tpu.memory_space<vmem>>) attributes {dimension_semantics = [], scalar_prefetch = 0 : i64, scratch_operands = 0 : i64, tpu.core_type = #tpu.core_type<tc>} {
    %0 = tpu.iota {dimensions = array<i32: 0>} : vector<32x1xi32>
    %c16_i32 = arith.constant 16 : i32
    %c0_i32 = arith.constant 0 : i32
    %1 = arith.cmpi eq, %c16_i32, %c0_i32 : i32
    %c1_i32 = arith.constant 1 : i32
    %2 = arith.select %1, %c1_i32, %c16_i32 : i32
    %3 = vector.broadcast %2 : i32 to vector<32x1xi32>
    %4 = arith.remsi %0, %3 : vector<32x1xi32>
    %c0_i32_0 = arith.constant 0 : i32
    %5 = vector.broadcast %c0_i32_0 : i32 to vector<32x1xi32>
    %6 = arith.cmpi ne, %4, %5 : vector<32x1xi32>
    %c0_i32_1 = arith.constant 0 : i32
    %7 = vector.broadcast %c0_i32_1 : i32 to vector<32x1xi32>
    %8 = arith.cmpi slt, %4, %7 : vector<32x1xi32>
    %c0_i32_2 = arith.constant 0 : i32
    %9 = arith.cmpi slt, %2, %c0_i32_2 : i32
    %10 = vector.broadcast %9 : i1 to vector<32x1xi1>
    %11 = vector.broadcast %10 : vector<32x1xi1> to vector<32x1xi1>
    %12 = arith.xori %8, %11 : vector<32x1xi1>
    %13 = arith.andi %12, %6 : vector<32x1xi1>
    %14 = vector.broadcast %2 : i32 to vector<32x1xi32>
    %15 = arith.addi %4, %14 : vector<32x1xi32>
    %16 = arith.select %13, %15, %4 : vector<32x1xi1>, vector<32x1xi32>
    %c0_i32_3 = arith.constant 0 : i32
    %17 = vector.broadcast %c0_i32_3 : i32 to vector<32x1xi32>
    %18 = arith.cmpi sgt, %16, %17 : vector<32x1xi32>
    %19 = arith.extui %18 : vector<32x1xi1> to vector<32x1xi32>
    %20 = arith.sitofp %19 : vector<32x1xi32> to vector<32x1xf32>
    %c15_i32 = arith.constant 15 : i32
    %21 = vector.broadcast %c15_i32 : i32 to vector<32x1xi32>
    %22 = arith.cmpi slt, %16, %21 : vector<32x1xi32>
    %23 = arith.extui %22 : vector<32x1xi1> to vector<32x1xi32>
    %24 = arith.sitofp %23 : vector<32x1xi32> to vector<32x1xf32>
    %c0 = arith.constant 0 : index
    %c0_4 = arith.constant 0 : index
    %25 = vector.load %arg0[%c0, %c0_4] : memref<32x128xf32, #tpu.memory_space<vmem>>, vector<32x128xf32>
    %c0_5 = arith.constant 0 : index
    %c0_6 = arith.constant 0 : index
    %26 = vector.load %arg4[%c0_5, %c0_6] : memref<8x128xf32, #tpu.memory_space<vmem>>, vector<8x128xf32>
    %27 = vector.extract_strided_slice %26 {offsets = [0, 0], sizes = [1, 128], strides = [1, 1]} : vector<8x128xf32> to vector<1x128xf32>
    %28 = vector.extract_strided_slice %26 {offsets = [1, 0], sizes = [1, 128], strides = [1, 1]} : vector<8x128xf32> to vector<1x128xf32>
    %29 = vector.extract_strided_slice %26 {offsets = [2, 0], sizes = [1, 128], strides = [1, 1]} : vector<8x128xf32> to vector<1x128xf32>
    %30 = vector.extract_strided_slice %26 {offsets = [3, 0], sizes = [1, 128], strides = [1, 1]} : vector<8x128xf32> to vector<1x128xf32>
    %31 = vector.extract_strided_slice %26 {offsets = [4, 0], sizes = [1, 128], strides = [1, 1]} : vector<8x128xf32> to vector<1x128xf32>
    %c1_i32_7 = arith.constant 1 : i32
    %32 = tpu.dynamic_rotate %25 by %c1_i32_7 dim 0 : vector<32x128xf32>, i32 -> vector<32x128xf32>
    %33 = vector.broadcast %20 : vector<32x1xf32> to vector<32x128xf32>
    %34 = arith.mulf %32, %33 : vector<32x128xf32>
    %c31_i32 = arith.constant 31 : i32
    %35 = tpu.dynamic_rotate %25 by %c31_i32 dim 0 : vector<32x128xf32>, i32 -> vector<32x128xf32>
    %36 = vector.broadcast %24 : vector<32x1xf32> to vector<32x128xf32>
    %37 = arith.mulf %35, %36 : vector<32x128xf32>
    %38 = tpu.concatenate %34, %25, %37 in 1 : vector<32x128xf32>, vector<32x128xf32>, vector<32x128xf32> -> vector<32x384xf32>
    %39 = arith.truncf %38 : vector<32x384xf32> to vector<32x384xbf16>
    %c0_8 = arith.constant 0 : index
    %c0_9 = arith.constant 0 : index
    %40 = vector.load %arg1[%c0_8, %c0_9] : memref<384x128xbf16, #tpu.memory_space<vmem>>, vector<384x128xbf16>
    %cst = arith.constant dense<0.000000e+00> : vector<32x128xf32>
    %41 = tpu.matmul %39, %40, %cst {dimension_numbers = #tpu.dot_dimension_numbers<[1], [0], [0], [1], [0, 0, 1, 1], [], []>} : vector<32x384xbf16>, vector<384x128xbf16>, vector<32x128xf32> -> vector<32x128xf32>
    %cst_10 = arith.constant dense<0.000000e+00> : vector<128xf32>
    %42 = vector.multi_reduction <add>, %41, %cst_10 [0] : vector<32x128xf32> to vector<128xf32>
    %43 = vector.shape_cast %42 : vector<128xf32> to vector<1x128xf32>
    %c64_i32 = arith.constant 64 : i32
    %44 = tpu.dynamic_rotate %43 by %c64_i32 dim 1 : vector<1x128xf32>, i32 -> vector<1x128xf32>
    %45 = arith.addf %43, %44 : vector<1x128xf32>
    %c32_i32 = arith.constant 32 : i32
    %46 = tpu.dynamic_rotate %45 by %c32_i32 dim 1 : vector<1x128xf32>, i32 -> vector<1x128xf32>
    %47 = arith.addf %45, %46 : vector<1x128xf32>
    %c16_i32_11 = arith.constant 16 : i32
    %48 = tpu.dynamic_rotate %47 by %c16_i32_11 dim 1 : vector<1x128xf32>, i32 -> vector<1x128xf32>
    %49 = arith.addf %47, %48 : vector<1x128xf32>
    %c8_i32 = arith.constant 8 : i32
    %50 = tpu.dynamic_rotate %49 by %c8_i32 dim 1 : vector<1x128xf32>, i32 -> vector<1x128xf32>
    %51 = arith.addf %49, %50 : vector<1x128xf32>
    %cst_12 = arith.constant 0.001953125 : f32
    %52 = vector.broadcast %cst_12 : f32 to vector<1x128xf32>
    %53 = arith.mulf %51, %52 : vector<1x128xf32>
    %54 = vector.broadcast %53 : vector<1x128xf32> to vector<32x128xf32>
    %55 = arith.subf %41, %54 : vector<32x128xf32>
    %56 = arith.mulf %55, %55 : vector<32x128xf32>
    %cst_13 = arith.constant dense<0.000000e+00> : vector<128xf32>
    %57 = vector.multi_reduction <add>, %56, %cst_13 [0] : vector<32x128xf32> to vector<128xf32>
    %58 = vector.shape_cast %57 : vector<128xf32> to vector<1x128xf32>
    %c64_i32_14 = arith.constant 64 : i32
    %59 = tpu.dynamic_rotate %58 by %c64_i32_14 dim 1 : vector<1x128xf32>, i32 -> vector<1x128xf32>
    %60 = arith.addf %58, %59 : vector<1x128xf32>
    %c32_i32_15 = arith.constant 32 : i32
    %61 = tpu.dynamic_rotate %60 by %c32_i32_15 dim 1 : vector<1x128xf32>, i32 -> vector<1x128xf32>
    %62 = arith.addf %60, %61 : vector<1x128xf32>
    %c16_i32_16 = arith.constant 16 : i32
    %63 = tpu.dynamic_rotate %62 by %c16_i32_16 dim 1 : vector<1x128xf32>, i32 -> vector<1x128xf32>
    %64 = arith.addf %62, %63 : vector<1x128xf32>
    %c8_i32_17 = arith.constant 8 : i32
    %65 = tpu.dynamic_rotate %64 by %c8_i32_17 dim 1 : vector<1x128xf32>, i32 -> vector<1x128xf32>
    %66 = arith.addf %64, %65 : vector<1x128xf32>
    %cst_18 = arith.constant 0.001953125 : f32
    %67 = vector.broadcast %cst_18 : f32 to vector<1x128xf32>
    %68 = arith.mulf %66, %67 : vector<1x128xf32>
    %cst_19 = arith.constant 9.99999974E-6 : f32
    %69 = vector.broadcast %cst_19 : f32 to vector<1x128xf32>
    %70 = arith.addf %68, %69 : vector<1x128xf32>
    %71 = math.rsqrt %70 : vector<1x128xf32>
    %72 = arith.mulf %28, %71 : vector<1x128xf32>
    %73 = vector.broadcast %72 : vector<1x128xf32> to vector<32x128xf32>
    %74 = arith.mulf %55, %73 : vector<32x128xf32>
    %75 = vector.broadcast %29 : vector<1x128xf32> to vector<32x128xf32>
    %76 = arith.addf %74, %75 : vector<32x128xf32>
    %cst_20 = arith.constant 0.000000e+00 : f32
    %77 = vector.broadcast %cst_20 : f32 to vector<32x128xf32>
    %78 = arith.maximumf %76, %77 : vector<32x128xf32>
    %c1_i32_21 = arith.constant 1 : i32
    %79 = tpu.dynamic_rotate %78 by %c1_i32_21 dim 0 : vector<32x128xf32>, i32 -> vector<32x128xf32>
    %80 = vector.broadcast %20 : vector<32x1xf32> to vector<32x128xf32>
    %81 = arith.mulf %79, %80 : vector<32x128xf32>
    %c31_i32_22 = arith.constant 31 : i32
    %82 = tpu.dynamic_rotate %78 by %c31_i32_22 dim 0 : vector<32x128xf32>, i32 -> vector<32x128xf32>
    %83 = vector.broadcast %24 : vector<32x1xf32> to vector<32x128xf32>
    %84 = arith.mulf %82, %83 : vector<32x128xf32>
    %85 = tpu.concatenate %81, %78, %84 in 1 : vector<32x128xf32>, vector<32x128xf32>, vector<32x128xf32> -> vector<32x384xf32>
    %86 = arith.truncf %85 : vector<32x384xf32> to vector<32x384xbf16>
    %c0_23 = arith.constant 0 : index
    %c0_24 = arith.constant 0 : index
    %87 = vector.load %arg2[%c0_23, %c0_24] : memref<384x128xbf16, #tpu.memory_space<vmem>>, vector<384x128xbf16>
    %cst_25 = arith.constant dense<0.000000e+00> : vector<32x128xf32>
    %88 = tpu.matmul %86, %87, %cst_25 {dimension_numbers = #tpu.dot_dimension_numbers<[1], [0], [0], [1], [0, 0, 1, 1], [], []>} : vector<32x384xbf16>, vector<384x128xbf16>, vector<32x128xf32> -> vector<32x128xf32>
    %cst_26 = arith.constant dense<0.000000e+00> : vector<128xf32>
    %89 = vector.multi_reduction <add>, %88, %cst_26 [0] : vector<32x128xf32> to vector<128xf32>
    %90 = vector.shape_cast %89 : vector<128xf32> to vector<1x128xf32>
    %c64_i32_27 = arith.constant 64 : i32
    %91 = tpu.dynamic_rotate %90 by %c64_i32_27 dim 1 : vector<1x128xf32>, i32 -> vector<1x128xf32>
    %92 = arith.addf %90, %91 : vector<1x128xf32>
    %c32_i32_28 = arith.constant 32 : i32
    %93 = tpu.dynamic_rotate %92 by %c32_i32_28 dim 1 : vector<1x128xf32>, i32 -> vector<1x128xf32>
    %94 = arith.addf %92, %93 : vector<1x128xf32>
    %c16_i32_29 = arith.constant 16 : i32
    %95 = tpu.dynamic_rotate %94 by %c16_i32_29 dim 1 : vector<1x128xf32>, i32 -> vector<1x128xf32>
    %96 = arith.addf %94, %95 : vector<1x128xf32>
    %c8_i32_30 = arith.constant 8 : i32
    %97 = tpu.dynamic_rotate %96 by %c8_i32_30 dim 1 : vector<1x128xf32>, i32 -> vector<1x128xf32>
    %98 = arith.addf %96, %97 : vector<1x128xf32>
    %cst_31 = arith.constant 0.001953125 : f32
    %99 = vector.broadcast %cst_31 : f32 to vector<1x128xf32>
    %100 = arith.mulf %98, %99 : vector<1x128xf32>
    %101 = vector.broadcast %100 : vector<1x128xf32> to vector<32x128xf32>
    %102 = arith.subf %88, %101 : vector<32x128xf32>
    %103 = arith.mulf %102, %102 : vector<32x128xf32>
    %cst_32 = arith.constant dense<0.000000e+00> : vector<128xf32>
    %104 = vector.multi_reduction <add>, %103, %cst_32 [0] : vector<32x128xf32> to vector<128xf32>
    %105 = vector.shape_cast %104 : vector<128xf32> to vector<1x128xf32>
    %c64_i32_33 = arith.constant 64 : i32
    %106 = tpu.dynamic_rotate %105 by %c64_i32_33 dim 1 : vector<1x128xf32>, i32 -> vector<1x128xf32>
    %107 = arith.addf %105, %106 : vector<1x128xf32>
    %c32_i32_34 = arith.constant 32 : i32
    %108 = tpu.dynamic_rotate %107 by %c32_i32_34 dim 1 : vector<1x128xf32>, i32 -> vector<1x128xf32>
    %109 = arith.addf %107, %108 : vector<1x128xf32>
    %c16_i32_35 = arith.constant 16 : i32
    %110 = tpu.dynamic_rotate %109 by %c16_i32_35 dim 1 : vector<1x128xf32>, i32 -> vector<1x128xf32>
    %111 = arith.addf %109, %110 : vector<1x128xf32>
    %c8_i32_36 = arith.constant 8 : i32
    %112 = tpu.dynamic_rotate %111 by %c8_i32_36 dim 1 : vector<1x128xf32>, i32 -> vector<1x128xf32>
    %113 = arith.addf %111, %112 : vector<1x128xf32>
    %cst_37 = arith.constant 0.001953125 : f32
    %114 = vector.broadcast %cst_37 : f32 to vector<1x128xf32>
    %115 = arith.mulf %113, %114 : vector<1x128xf32>
    %cst_38 = arith.constant 9.99999974E-6 : f32
    %116 = vector.broadcast %cst_38 : f32 to vector<1x128xf32>
    %117 = arith.addf %115, %116 : vector<1x128xf32>
    %118 = math.rsqrt %117 : vector<1x128xf32>
    %119 = arith.mulf %30, %118 : vector<1x128xf32>
    %120 = vector.broadcast %119 : vector<1x128xf32> to vector<32x128xf32>
    %121 = arith.mulf %102, %120 : vector<32x128xf32>
    %122 = vector.broadcast %31 : vector<1x128xf32> to vector<32x128xf32>
    %123 = arith.addf %121, %122 : vector<32x128xf32>
    %124 = arith.truncf %25 : vector<32x128xf32> to vector<32x128xbf16>
    %c0_39 = arith.constant 0 : index
    %c0_40 = arith.constant 0 : index
    %125 = vector.load %arg3[%c0_39, %c0_40] : memref<128x128xbf16, #tpu.memory_space<vmem>>, vector<128x128xbf16>
    %cst_41 = arith.constant dense<0.000000e+00> : vector<32x128xf32>
    %126 = tpu.matmul %124, %125, %cst_41 {dimension_numbers = #tpu.dot_dimension_numbers<[1], [0], [0], [1], [0, 0, 1, 1], [], []>} : vector<32x128xbf16>, vector<128x128xbf16>, vector<32x128xf32> -> vector<32x128xf32>
    %127 = vector.broadcast %27 : vector<1x128xf32> to vector<32x128xf32>
    %128 = arith.addf %126, %127 : vector<32x128xf32>
    %129 = arith.addf %123, %128 : vector<32x128xf32>
    %cst_42 = arith.constant 0.000000e+00 : f32
    %130 = vector.broadcast %cst_42 : f32 to vector<32x128xf32>
    %131 = arith.maximumf %129, %130 : vector<32x128xf32>
    %c0_43 = arith.constant 0 : index
    %c0_44 = arith.constant 0 : index
    %132 = vector.load %arg5[%c0_43, %c0_44] : memref<32x128xf32, #tpu.memory_space<vmem>>, vector<32x128xf32>
    tpu.vector_store %arg5[%c0_43, %c0_44], %131 {strides = array<i32>} : memref<32x128xf32, #tpu.memory_space<vmem>>, vector<32x128xf32>,
    return
  }
}

</mosaic_0001>

<bundles_post_ra>
// kernel: residual_forward.1
= control target key start
LH: loop header
LB: loop body
LE: loop exit
PB: predicated region body
PF: predicated region fallthrough
CT: control target
= control target key end

     0   :  { %v21_v6 = vlaneseq  ;;  %v1309_v29 = vmov 0.0   ;;  %s1312_s24 = smov 16   ;;  %s1313_s25 = smov 8   ;;  %s1682_s1 = inlined_call_operand.vmem [shape: bf16[384,128], index: 1, kind: input, shape index: {}]   ;;  %s1683_s0 = inlined_call_operand.vmem [shape: f32[32,128], index: 0, kind: input, shape index: {}]   ;;  %s1684_s2 = inlined_call_operand.vmem [shape: bf16[384,128], index: 2, kind: input, shape index: {}]   ;;  %s1685_s4 = inlined_call_operand.vmem [shape: f32[8,128], index: 4, kind: input, shape index: {}]   ;;  %s1686_s3 = inlined_call_operand.vmem [shape: bf16[128,128], index: 3, kind: input, shape index: {}]   ;;  %s1687_s5 = inlined_call_operand.vmem [shape: f32[32,128], index: 5, kind: output, shape index: {}]  }
   0x1   :  { %v1249_v0 = vld [vmem:[%s1682_s1 + $0x40] sm:$0xff]   ;;  %v1252_v3 = vld [vmem:[%s1682_s1 + $0x48] sm:$0xff]   ;;  %v1255_v7 = vld [vmem:[%s1682_s1 + $0x50] sm:$0xff]  }
   0x2   :  { %v1250_v1 = vld [vmem:[%s1682_s1] sm:$0xff]   ;;  %1098 = vmatprep.subr.bf16.mxu0 %v1249_v0  ;;  %v1253_v4 = vld [vmem:[%s1682_s1 + $0x8] sm:$0xff]   ;;  %v1256_v8 = vld [vmem:[%s1682_s1 + $0x10] sm:$0xff]   ;;  %v1374_v11 = vshrl.u32 %v21_v6, 7 }
   0x3   :  { %v1251_v2 = vld [vmem:[%s1682_s1 + $0x80] sm:$0xff]   ;;  %1099 = vmatpush3.bf16.msra.mxu0 %v1250_v1  ;;  %v1254_v5 = vld [vmem:[%s1682_s1 + $0x88] sm:$0xff]   ;;  %v1257_v9 = vld [vmem:[%s1682_s1 + $0x90] sm:$0xff]  }
   0x4   :  { %1184 = vmatprep.subr.bf16.mxu1 %v1251_v2  ;;  %1100 = vmatprep.subr.bf16.mxu0 %v1252_v3  ;;  %v1258_v10 = vld [vmem:[%s1682_s1 + $0x58] sm:$0xff]   ;;  %v1261_v14 = vld [vmem:[%s1682_s1 + $0x60] sm:$0xff]   ;;  %v23_v15 = vadd.s32 8, %v1374_v11  ;;  %v30_v17 = vand.u32 15, %v1374_v11  ;;  %v25_v19 = vadd.s32 24, %v1374_v11  ;;  %v1264_v20 = vld [vmem:[%s1682_s1 + $0x68] sm:$0xff]  }
   0x5   :  { %1185 = vmatpush3.bf16.msra.mxu1 %v1251_v2  ;;  %v1259_v12 = vld [vmem:[%s1682_s1 + $0x18] sm:$0xff]   ;;  %v1263_v16 = vld [vmem:[%s1682_s1 + $0xa0] sm:$0xff]   ;;  %vm107_vm0 = vcmp.lt.s32.totalorder %v1374_v11, 1  ;;  %v1266_v22 = vld [vmem:[%s1682_s1 + $0xa8] sm:$0xff]   ;;  %v24_v26 = vadd.s32 16, %v1374_v11  ;;  %vm120_vm3 = vcmp.lt.s32.totalorder %v1374_v11, 7 }
   0x6   :  { %1186 = vmatprep.subr.bf16.mxu1 %v1254_v5  ;;  %v1260_v13 = vld [vmem:[%s1682_s1 + $0x98] sm:$0xff]   ;;  %v1262_v18 = vld [vmem:[%s1682_s1 + $0x20] sm:$0xff]   ;;  %v37_v21 = vand.u32 15, %v23_v15  ;;  %vm74_vm1 = vcmp.gt.s32.totalorder %v30_v17, 0  ;;  %v1265_v23 = vld [vmem:[%s1682_s1 + $0x28] sm:$0xff]   ;;  %v51_v24 = vand.u32 15, %v25_v19 }
   0x7   :  { %1101 = vmatpush3.bf16.msra.mxu0 %v1253_v4  ;;  %v1267_v25 = vld [vmem:[%s1682_s1 + $0x70] sm:$0xff]   ;;  %v1414_v30 = vsel %vm74_vm1, 1.0, %v1309_v29  ;;  %v1270_v31 = vld [vmem:[%s1682_s1 + $0x78] sm:$0xff]   ;;  %v98_v32 = vld [vmem:[%s1683_s0] sm:$0xff]  ;;  %v44_v37 = vand.u32 15, %v24_v26 }
   0x8   :  { %1102 = vmatprep.subr.bf16.mxu0 %v1255_v7  ;;  %v1268_v27 = vld [vmem:[%s1682_s1 + $0x30] sm:$0xff]   ;;  %vm87_vm2 = vcmp.lt.s32.totalorder %v37_v21, 15  ;;  %v99_v33 = vld [vmem:[%s1683_s0 + $0x8] sm:$0xff]  ;;  %v101_v34 = vld [vmem:[%s1683_s0 + $0x18] sm:$0xff]  ;;  %vm1431_vm4 = vcmp.lt.s32.totalorder %v51_v24, 15  ;;  %v103_v38 = vrot.slane %v98_v32, 7 }
   0x9   :  { %1187 = vmatpush3.bf16.msra.mxu1 %v1254_v5  ;;  %v1269_v28 = vld [vmem:[%s1682_s1 + $0xb0] sm:$0xff]   ;;  %v1429_v35 = vsel %vm87_vm2, 1.0, %v1309_v29  ;;  %v104_v39 = vrot.slane %v99_v33, 7  ;;  %v1435_v40 = vpack.c.bf16 %v99_v33, %v98_v32  ;;  %v106_v41 = vrot.slane %v101_v34, 7  ;;  %v1272_v43 = vld [vmem:[%s1682_s1 + $0xb8] sm:$0xff]  }
   0xa   :  { %1188 = vmatprep.subr.bf16.mxu1 %v1257_v9  ;;  %v100_v42 = vld [vmem:[%s1683_s0 + $0x10] sm:$0xff]  ;;  %v116_v44 = vrot.slane %v98_v32, 1  ;;  %v117_v45 = vrot.slane %v99_v33, 1  ;;  %v119_v47 = vrot.slane %v101_v34, 1  ;;  %v1271_v48 = vld [vmem:[%s1682_s1 + $0x38] sm:$0xff]   ;;  %v1453_v51 = vsel %vm1431_vm4, 1.0, %v1309_v29 }
   0xb   :  { %1103 = vmatpush3.bf16.msra.mxu0 %v1256_v8  ;;  %v118_v46 = vrot.slane %v100_v42, 1  ;;  %359 = vmatprep.mubr.bf16.mxu0 %v1435_v40  ;;  %v110_v49 = vsel %vm107_vm0, %v103_v38, %v104_v39  ;;  %v111_v50 = vsel %vm107_vm0, %v106_v41, %v103_v38  ;;  %v105_v52 = vrot.slane %v100_v42, 7  ;;  %s1310_s0 = smov 64   ;;  %s1311_s1 = smov 32  }
   0xc   :  { %1104 = vmatprep.subr.bf16.mxu0 %v1258_v10  ;;  %v112_v53 = vmul.f32 %v1414_v30, %v111_v50  ;;  %v123_v55 = vsel %vm120_vm3, %v116_v44, %v117_v45  ;;  %vm76_vm5 = vcmp.gt.s32.totalorder %v44_v37, 0  ;;  %v124_v58 = vsel %vm120_vm3, %v119_v47, %v116_v44 }
   0xd   :  { %1189 = vmatpush3.bf16.msra.mxu1 %v1257_v9  ;;  %v122_v54 = vsel %vm120_vm3, %v117_v45, %v118_v46  ;;  %v121_v57 = vsel %vm120_vm3, %v118_v46, %v119_v47  ;;  %v128_v60 = vmul.f32 %v1453_v51, %v124_v58  ;;  %v1466_v62 = vpack.c.bf16 %v101_v34, %v100_v42 }
   0xe   :  { %1190 = vmatprep.subr.bf16.mxu1 %v1260_v13  ;;  %v126_v56 = vmul.f32 %v1429_v35, %v122_v54  ;;  %v129_v59 = vpack.c.bf16 %v110_v49, %v112_v53  ;;  %v1468_v63 = vsel %vm76_vm5, 1.0, %v1309_v29  ;;  %v109_v0 = vsel %vm107_vm0, %v104_v39, %v105_v52 }
   0xf   :  { %1105 = vmatpush3.bf16.msra.mxu0 %v1259_v12  ;;  %v134_v1 = vpack.c.bf16 %v128_v60, %v121_v57  ;;  %v114_v2 = vmul.f32 %v1468_v63, %v109_v0  ;;  %v108_v3 = vsel %vm107_vm0, %v105_v52, %v106_v41  ;;  %v1481_v45 = vsub.s32 0, %v1374_v11 }
  0x10   :  { %1106 = vmatprep.subr.bf16.mxu0 %v1261_v14  ;;  %v131_v61 = vpack.c.bf16 %v126_v56, %v123_v55 }
  0x11   :  { %1191 = vmatpush3.bf16.msra.mxu1 %v1260_v13  ;;  %v132_v4 = vpack.c.bf16 %v108_v3, %v114_v2 }
  0x12   :  { %1192 = vmatprep.subr.bf16.mxu1 %v1263_v16  ;;  %1200 = vmatprep.mubr.bf16.mxu1 %v131_v61 }
  0x13   :  { %1107 = vmatpush3.bf16.msra.mxu0 %v1262_v18 }
  0x14   :  { %1108 = vmatprep.subr.bf16.mxu0 %v1264_v20 }
  0x15   :  { %1193 = vmatpush3.bf16.msra.mxu1 %v1263_v16 }
  0x16   :  { %1194 = vmatprep.subr.bf16.mxu1 %v1266_v22 }
  0x17   :  { %1109 = vmatpush3.bf16.msra.mxu0 %v1265_v23 }
  0x18   :  { %1110 = vmatprep.subr.bf16.mxu0 %v1267_v25 }
  0x19   :  { %1195 = vmatpush3.bf16.msra.mxu1 %v1266_v22 }
  0x1a   :  { %1196 = vmatprep.subr.bf16.mxu1 %v1269_v28 }
  0x1b   :  { %1111 = vmatpush3.bf16.msra.mxu0 %v1268_v27 }
  0x1c   :  { %1112 = vmatprep.subr.bf16.mxu0 %v1270_v31 }
  0x1d   :  { %1197 = vmatpush3.bf16.msra.mxu1 %v1269_v28 }
  0x1e   :  { %1198 = vmatprep.subr.bf16.mxu1 %v1272_v43 }
  0x1f   :  { %1113 = vmatpush3.bf16.msra.mxu0 %v1271_v48 }
  0x21   :  { %1199 = vmatpush3.bf16.msra.mxu1 %v1272_v43 }
  0x22   :  { %360 = vmatmul.mubr.bf16.vlgmr.msra.gmra.mrb[0].mxu0 %v129_v59 }
  0x23   :  { %367 = vmatprep.mubr.bf16.mxu0 %v1466_v62 }
  0x24   :  { %1201 = vmatmul.mubr.bf16.vlgmr.msra.gmra.mrb[0].mxu1 %v134_v1 }
  0x2a   :  { %368 = vmatmul.mubr.bf16.gmra.mrb[4].mxu0 %v132_v4 }
  0xf5   :  { %v1114_v5 = vpop.f32.mrb[0].mxu0 }
  0xf6   :  { %v1115_v6 = vpop.f32.mrb[1].mxu0 }
  0xf7   :  { %v1116_v7 = vadd.f32 %v1115_v6, %v1114_v5  ;;  %v1117_v8 = vpop.f32.mrb[2].mxu0  ;;  %v1202_v9 = vpop.f32.mrb[0].mxu1 }
  0xf8   :  { %v1118_v10 = vpop.f32.mrb[3].mxu0  ;;  %v410_v12 = vpop.f32.mrb[1].mxu1 }
  0xf9   :  { %v1119_v13 = vadd.f32 %v1118_v10, %v1117_v8  ;;  %v411_v14 = vadd.f32 %v1116_v7, %v410_v12  ;;  %v1203_v15 = vpop.f32.mrb[2].mxu1  ;;  %v1274_v10 = vld [vmem:[%s1684_s2] sm:$0xff]  }
  0xfa   :  { %v413_v16 = vpop.f32.mrb[3].mxu1  ;;  %v1275_v12 = vld [vmem:[%s1684_s2 + $0x80] sm:$0xff]  }
  0xfb   :  { %v414_v17 = vadd.f32 %v1119_v13, %v413_v16  ;;  %1204 = vmatprep.subr.bf16.mxu1 %v1275_v12  ;;  %v1276_v13 = vld [vmem:[%s1684_s2 + $0x48] sm:$0xff]  }
  0xfc   :  { %1205 = vmatpush3.bf16.msra.mxu1 %v1275_v12 }
  0xfd   :  { %v1120_v18 = vpop.f32.mrb[4].mxu0  ;;  %v425_v23 = vadd.f32 %v414_v17, %v411_v14 }
  0xfe   :  { %v1121_v19 = vpop.f32.mrb[5].mxu0 }
  0xff   :  { %v1122_v20 = vadd.f32 %v1121_v19, %v1120_v18  ;;  %v1123_v21 = vpop.f32.mrb[6].mxu0  ;;  %v1280_v19 = vld [vmem:[%s1684_s2 + $0x10] sm:$0xff]  }
 0x100   :  { %v1124_v22 = vpop.f32.mrb[7].mxu0 }
 0x101   :  { %v419_v24 = vadd.f32 %v1202_v9, %v1122_v20  ;;  %v1125_v25 = vadd.f32 %v1124_v22, %v1123_v21  ;;  %v1273_v9 = vld [vmem:[%s1684_s2 + $0x40] sm:$0xff]   ;;  %v1281_v20 = vld [vmem:[%s1684_s2 + $0x90] sm:$0xff]   ;;  %v1282_v21 = vld [vmem:[%s1684_s2 + $0x58] sm:$0xff]  }
 0x102   :  { %1136 = vmatprep.subr.bf16.mxu0 %v1273_v9  ;;  %v1283_v22 = vld [vmem:[%s1684_s2 + $0x18] sm:$0xff]  }
 0x103   :  { %v426_v26 = vadd.f32 %v425_v23, %v419_v24  ;;  %v422_v27 = vadd.f32 %v1203_v15, %v1125_v25  ;;  %1137 = vmatpush3.bf16.msra.mxu0 %v1274_v10  ;;  %v1278_v15 = vld [vmem:[%s1684_s2 + $0x88] sm:$0xff]   ;;  %v1284_v23 = vld [vmem:[%s1684_s2 + $0x98] sm:$0xff]   ;;  %v1286_v25 = vld [vmem:[%s1684_s2 + $0x20] sm:$0xff]  }
 0x104   :  { %1138 = vmatprep.subr.bf16.mxu0 %v1276_v13  ;;  %1206 = vmatprep.subr.bf16.mxu1 %v1278_v15 }
 0x105   :  { %v427_v28 = vadd.f32 %v426_v26, %v422_v27  ;;  %1207 = vmatpush3.bf16.msra.mxu1 %v1278_v15  ;;  %v1287_v26 = vld [vmem:[%s1684_s2 + $0xa0] sm:$0xff]  }
 0x106   :  { %1208 = vmatprep.subr.bf16.mxu1 %v1281_v20 }
 0x107   :  { %v428_v29 = vrot.slane %v427_v28, 4 }
 0x109   :  { %v429_v31 = vadd.f32 %v428_v29, %v427_v28  ;;  %1209 = vmatpush3.bf16.msra.mxu1 %v1281_v20  ;;  %v1289_v28 = vld [vmem:[%s1684_s2 + $0x28] sm:$0xff]  }
 0x10a   :  { %1210 = vmatprep.subr.bf16.mxu1 %v1284_v23  ;;  %v1290_v29 = vld [vmem:[%s1684_s2 + $0xa8] sm:$0xff]  }
 0x10b   :  { %v430_v32 = vrot.slane %v429_v31, 2 }
 0x10d   :  { %v431_v33 = vadd.f32 %v430_v32, %v429_v31  ;;  %1211 = vmatpush3.bf16.msra.mxu1 %v1284_v23  ;;  %v1291_v31 = vld [vmem:[%s1684_s2 + $0x70] sm:$0xff]  }
 0x10e   :  { %1212 = vmatprep.subr.bf16.mxu1 %v1287_v26  ;;  %v1293_v32 = vld [vmem:[%s1684_s2 + $0xb0] sm:$0xff]  }
 0x10f   :  { %v432_v34 = vrot.slane %v431_v33, 1 }
 0x111   :  { %v433_v36 = vadd.f32 %v432_v34, %v431_v33  ;;  %1213 = vmatpush3.bf16.msra.mxu1 %v1287_v26  ;;  %v1292_v33 = vld [vmem:[%s1684_s2 + $0x30] sm:$0xff]   ;;  %v1294_v34 = vld [vmem:[%s1684_s2 + $0x78] sm:$0xff]  }
 0x112   :  { %1214 = vmatprep.subr.bf16.mxu1 %v1290_v29 }
 0x113   :  { %434 = vrot.lane.b32.xlu0 %v433_v36, %s1310_s0 }
 0x115   :  { %1215 = vmatpush3.bf16.msra.mxu1 %v1290_v29 }
 0x116   :  { %1216 = vmatprep.subr.bf16.mxu1 %v1293_v32 }
 0x119   :  { %1217 = vmatpush3.bf16.msra.mxu1 %v1293_v32 }
 0x185   :  { %v435_v37 = vpop.permute.xlu0 %434 }
 0x186   :  { %v436_v38 = vadd.f32 %v435_v37, %v433_v36  ;;  %v1295_v36 = vld [vmem:[%s1684_s2 + $0x38] sm:$0xff]  }
 0x187   :  { %v1296_v37 = vld [vmem:[%s1684_s2 + $0xb8] sm:$0xff]  }
 0x188   :  { %437 = vrot.lane.b32.xlu0 %v436_v38, %s1311_s1  ;;  %1218 = vmatprep.subr.bf16.mxu1 %v1296_v37 }
 0x189   :  { %1219 = vmatpush3.bf16.msra.mxu1 %v1296_v37 }
 0x1fa   :  { %v438_v39 = vpop.permute.xlu0 %437 }
 0x1fb   :  { %v439_v41 = vadd.f32 %v438_v39, %v436_v38 }
 0x1fd   :  { %440 = vrot.lane.b32.xlu1 %v439_v41, %s1312_s24 }
 0x26f   :  { %v441_v42 = vpop.permute.xlu1 %440 }
 0x270   :  { %v442_v43 = vadd.f32 %v441_v42, %v439_v41 }
 0x272   :  { %443 = vrot.lane.b32.xlu1 %v442_v43, %s1313_s25 }
 0x2e4   :  { %v444_v44 = vpop.permute.xlu1 %443 }
 0x2e5   :  { %v445_v46 = vadd.f32 %v444_v44, %v442_v43  ;;  %v1579_v44 = vld [vmem:[%s1685_s4] sm:$0xff] }
 0x2e7   :  { %v446_v47 = vmul.f32 0.001953125, %v445_v46  ;;  %v489_v46 = vsub.s32 1, %v1374_v11 }
 0x2e9   :  { %v450_v48 = vrot.slane %v446_v47, %v1481_v45 }
 0x2eb   :  { %v1484_v49 = vsub.f32 %v411_v14, %v450_v48  ;;  %v1486_v50 = vsub.f32 %v414_v17, %v450_v48  ;;  %v1488_v52 = vsub.f32 %v419_v24, %v450_v48  ;;  %v1490_v53 = vsub.f32 %v422_v27, %v450_v48  ;;  %v1277_v14 = vld [vmem:[%s1684_s2 + $0x8] sm:$0xff]   ;;  %v1279_v17 = vld [vmem:[%s1684_s2 + $0x50] sm:$0xff]   ;;  %v1285_v24 = vld [vmem:[%s1684_s2 + $0x60] sm:$0xff]  }
 0x2ec   :  { %1139 = vmatpush3.bf16.msra.mxu0 %v1277_v14  ;;  %v1288_v27 = vld [vmem:[%s1684_s2 + $0x68] sm:$0xff]   ;;  %v497_v48 = vsub.s32 2, %v1374_v11 }
 0x2ed   :  { %v455_v54 = vmul.f32 %v1484_v49, %v1484_v49  ;;  %v456_v55 = vmul.f32 %v1486_v50, %v1486_v50  ;;  %v457_v56 = vmul.f32 %v1488_v52, %v1488_v52  ;;  %v458_v58 = vmul.f32 %v1490_v53, %v1490_v53  ;;  %1140 = vmatprep.subr.bf16.mxu0 %v1279_v17 }
 0x2ef   :  { %v459_v57 = vadd.f32 %v456_v55, %v455_v54 }
 0x2f0   :  { %1141 = vmatpush3.bf16.msra.mxu0 %v1280_v19 }
 0x2f1   :  { %v460_v59 = vadd.f32 %v459_v57, %v457_v56  ;;  %1142 = vmatprep.subr.bf16.mxu0 %v1282_v21  ;;  %v498_v56 = vrot.slane %v1579_v44, %v497_v48 }
 0x2f3   :  { %v461_v60 = vadd.f32 %v460_v59, %v458_v58 }
 0x2f4   :  { %1143 = vmatpush3.bf16.msra.mxu0 %v1283_v22 }
 0x2f5   :  { %v462_v61 = vrot.slane %v461_v60, 4  ;;  %1144 = vmatprep.subr.bf16.mxu0 %v1285_v24 }
 0x2f7   :  { %v463_v0 = vadd.f32 %v462_v61, %v461_v60 }
 0x2f8   :  { %1145 = vmatpush3.bf16.msra.mxu0 %v1286_v25 }
 0x2f9   :  { %v464_v1 = vrot.slane %v463_v0, 2  ;;  %1146 = vmatprep.subr.bf16.mxu0 %v1288_v27 }
 0x2fb   :  { %v465_v2 = vadd.f32 %v464_v1, %v463_v0 }
 0x2fc   :  { %1147 = vmatpush3.bf16.msra.mxu0 %v1289_v28 }
 0x2fd   :  { %v466_v3 = vrot.slane %v465_v2, 1  ;;  %1148 = vmatprep.subr.bf16.mxu0 %v1291_v31 }
 0x2ff   :  { %v467_v4 = vadd.f32 %v466_v3, %v465_v2 }
 0x300   :  { %1149 = vmatpush3.bf16.msra.mxu0 %v1292_v33 }
 0x301   :  { %468 = vrot.lane.b32.xlu0 %v467_v4, %s1310_s0  ;;  %1150 = vmatprep.subr.bf16.mxu0 %v1294_v34 }
 0x304   :  { %1151 = vmatpush3.bf16.msra.mxu0 %v1295_v36 }
 0x373   :  { %v469_v5 = vpop.permute.xlu0 %468 }
 0x374   :  { %v470_v6 = vadd.f32 %v469_v5, %v467_v4 }
 0x376   :  { %471 = vrot.lane.b32.xlu1 %v470_v6, %s1311_s1 }
 0x3e8   :  { %v472_v7 = vpop.permute.xlu1 %471 }
 0x3e9   :  { %v473_v8 = vadd.f32 %v472_v7, %v470_v6 }
 0x3eb   :  { %474 = vrot.lane.b32.xlu0 %v473_v8, %s1312_s24 }
 0x45d   :  { %v475_v16 = vpop.permute.xlu0 %474 }
 0x45e   :  { %v476_v18 = vadd.f32 %v475_v16, %v473_v8 }
 0x460   :  { %477 = vrot.lane.b32.xlu1 %v476_v18, %s1313_s25 }
 0x4d2   :  { %v478_v38 = vpop.permute.xlu1 %477 }
 0x4d3   :  { %v479_v39 = vadd.f32 %v478_v38, %v476_v18 }
 0x4d5   :  { %v480_v41 = vmul.f32 0.001953125, %v479_v39 }
 0x4d7   :  { %v481_v42 = vadd.f32 1e-05, %v480_v41 }
 0x4d9   :  { %1305 = vrsqrt.f32 %v481_v42 }
 0x4e3   :  { %v1306_v43 = vpop.eup %1305 }
 0x4e4   :  { %v484_v47 = vrot.slane %v1306_v43, 7 }
 0x4e6   :  { %v486_v54 = vmul.f32 %v484_v47, %v1579_v44 }
 0x4e8   :  { %v490_v55 = vrot.slane %v486_v54, %v489_v46 }
 0x4ea   :  { %v493_v57 = vmul.f32 %v490_v55, %v1488_v52  ;;  %v494_v58 = vmul.f32 %v490_v55, %v1490_v53  ;;  %v491_v59 = vmul.f32 %v490_v55, %v1484_v49  ;;  %v492_v60 = vmul.f32 %v490_v55, %v1486_v50 }
 0x4ec   :  { %v499_v61 = vadd.f32 %v498_v56, %v491_v59  ;;  %v500_v0 = vadd.f32 %v498_v56, %v492_v60  ;;  %v502_v1 = vadd.f32 %v498_v56, %v494_v58  ;;  %v501_v2 = vadd.f32 %v498_v56, %v493_v57 }
 0x4ee   :  { %v503_v3 = vmax.f32 %v499_v61, 0.0  ;;  %v504_v4 = vmax.f32 %v500_v0, 0.0  ;;  %v506_v5 = vmax.f32 %v502_v1, 0.0  ;;  %v505_v6 = vmax.f32 %v501_v2, 0.0 }
 0x4f0   :  { %v507_v7 = vrot.slane %v503_v3, 7  ;;  %v508_v8 = vrot.slane %v504_v4, 7  ;;  %v532_v9 = vpack.c.bf16 %v504_v4, %v503_v3  ;;  %v510_v10 = vrot.slane %v506_v5, 7 }
 0x4f1   :  { %v519_v12 = vrot.slane %v503_v3, 1  ;;  %v520_v52 = vrot.slane %v504_v4, 1  ;;  %v521_v13 = vrot.slane %v505_v6, 1  ;;  %v522_v50 = vrot.slane %v506_v5, 1 }
 0x4f2   :  { %761 = vmatprep.mubr.bf16.mxu0 %v532_v9  ;;  %v514_v49 = vsel %vm107_vm0, %v510_v10, %v507_v7  ;;  %v509_v53 = vrot.slane %v505_v6, 7  ;;  %v513_v16 = vsel %vm107_vm0, %v507_v7, %v508_v8  ;;  %v535_v23 = vpack.c.bf16 %v506_v5, %v505_v6 }
 0x4f3   :  { %v515_v14 = vmul.f32 %v1414_v30, %v514_v49  ;;  %v524_v15 = vsel %vm120_vm3, %v520_v52, %v521_v13  ;;  %v526_v18 = vsel %vm120_vm3, %v522_v50, %v519_v12  ;;  %v525_v20 = vsel %vm120_vm3, %v519_v12, %v520_v52 }
 0x4f4   :  { %v528_v17 = vmul.f32 %v1429_v35, %v524_v15  ;;  %v530_v21 = vmul.f32 %v1453_v51, %v526_v18  ;;  %v523_v30 = vsel %vm120_vm3, %v521_v13, %v522_v50  ;;  %v512_v24 = vsel %vm107_vm0, %v508_v8, %v509_v53 }
 0x4f5   :  { %v531_v19 = vpack.c.bf16 %v513_v16, %v515_v14  ;;  %v517_v35 = vmul.f32 %v1468_v63, %v512_v24  ;;  %v511_v26 = vsel %vm107_vm0, %v509_v53, %v510_v10 }
 0x4f6   :  { %v533_v22 = vpack.c.bf16 %v528_v17, %v525_v20  ;;  %v536_v25 = vpack.c.bf16 %v530_v21, %v523_v30 }
 0x4f7   :  { %762 = vmatmul.mubr.bf16.vlgmr.msra.gmra.mrb[8].mxu0 %v531_v19  ;;  %v534_v27 = vpack.c.bf16 %v511_v26, %v517_v35  ;;  %v1298_v35 = vld [vmem:[%s1686_s3 + $0x8] sm:$0xff]   ;;  %v1299_v26 = vld [vmem:[%s1686_s3 + $0x10] sm:$0xff]  }
 0x4f8   :  { %1220 = vmatprep.mubr.bf16.mxu1 %v533_v22  ;;  %769 = vmatprep.mubr.bf16.mxu0 %v535_v23 }
 0x4f9   :  { %1221 = vmatmul.mubr.bf16.vlgmr.msra.gmra.mrb[4].mxu1 %v536_v25  ;;  %v1297_v25 = vld [vmem:[%s1686_s3] sm:$0xff]  }
 0x4fa   :  { %1224 = vmatprep.subr.bf16.mxu0 %v1297_v25 }
 0x4fb   :  { %1225 = vmatpush3.bf16.msra.mxu0 %v1297_v25 }
 0x4fc   :  { %1226 = vmatprep.subr.bf16.mxu0 %v1298_v35 }
 0x4ff   :  { %770 = vmatmul.mubr.bf16.gmra.mrb[12].mxu0 %v534_v27 }
 0x500   :  { %1240 = vmatprep.mubr.bf16.mxu0 %v1435_v40  ;;  %1227 = vmatpush3.bf16.msra.mxu0 %v1298_v35 }
 0x501   :  { %1228 = vmatprep.subr.bf16.mxu0 %v1299_v26 }
 0x504   :  { %1229 = vmatpush3.bf16.msra.mxu0 %v1299_v26 }
 0x5ca   :  { %v1152_v51 = vpop.f32.mrb[8].mxu0 }
 0x5cb   :  { %v1153_v28 = vpop.f32.mrb[9].mxu0 }
 0x5cc   :  { %v1154_v29 = vadd.f32 %v1153_v28, %v1152_v51  ;;  %v1222_v31 = vpop.f32.mrb[4].mxu1  ;;  %v1155_v32 = vpop.f32.mrb[10].mxu0  ;;  %v1300_v28 = vld [vmem:[%s1686_s3 + $0x18] sm:$0xff]  }
 0x5cd   :  { %v812_v33 = vpop.f32.mrb[5].mxu1  ;;  %v1156_v34 = vpop.f32.mrb[11].mxu0  ;;  %1230 = vmatprep.subr.bf16.mxu0 %v1300_v28 }
 0x5ce   :  { %v813_v36 = vadd.f32 %v1154_v29, %v812_v33  ;;  %v1157_v37 = vadd.f32 %v1156_v34, %v1155_v32  ;;  %v1223_v38 = vpop.f32.mrb[6].mxu1  ;;  %v1301_v29 = vld [vmem:[%s1686_s3 + $0x20] sm:$0xff]   ;;  %1231 = vmatpush3.bf16.msra.mxu0 %v1300_v28  ;;  %v1303_v32 = vld [vmem:[%s1686_s3 + $0x30] sm:$0xff]   ;;  %v1304_v33 = vld [vmem:[%s1686_s3 + $0x38] sm:$0xff]  }
 0x5cf   :  { %v815_v39 = vpop.f32.mrb[7].mxu1  ;;  %1232 = vmatprep.subr.bf16.mxu0 %v1301_v29 }
 0x5d0   :  { %v816_v41 = vadd.f32 %v1157_v37, %v815_v39 }
 0x5d2   :  { %v1158_v63 = vpop.f32.mrb[12].mxu0  ;;  %v827_v48 = vadd.f32 %v816_v41, %v813_v36  ;;  %1233 = vmatpush3.bf16.msra.mxu0 %v1301_v29 }
 0x5d3   :  { %v1159_v42 = vpop.f32.mrb[13].mxu0 }
 0x5d4   :  { %v1160_v43 = vadd.f32 %v1159_v42, %v1158_v63  ;;  %v1161_v46 = vpop.f32.mrb[14].mxu0 }
 0x5d5   :  { %v1162_v47 = vpop.f32.mrb[15].mxu0 }
 0x5d6   :  { %v821_v54 = vadd.f32 %v1222_v31, %v1160_v43  ;;  %v1163_v40 = vadd.f32 %v1162_v47, %v1161_v46  ;;  %v1302_v31 = vld [vmem:[%s1686_s3 + $0x28] sm:$0xff]  }
 0x5d7   :  { %1234 = vmatprep.subr.bf16.mxu0 %v1302_v31 }
 0x5d8   :  { %v828_v55 = vadd.f32 %v827_v48, %v821_v54  ;;  %v824_v56 = vadd.f32 %v1223_v38, %v1163_v40  ;;  %1235 = vmatpush3.bf16.msra.mxu0 %v1302_v31 }
 0x5d9   :  { %1236 = vmatprep.subr.bf16.mxu0 %v1303_v32 }
 0x5da   :  { %v829_v57 = vadd.f32 %v828_v55, %v824_v56  ;;  %v899_v55 = vsub.s32 4, %v1374_v11 }
 0x5dc   :  { %v830_v58 = vrot.slane %v829_v57, 4  ;;  %1237 = vmatpush3.bf16.msra.mxu0 %v1303_v32 }
 0x5dd   :  { %1238 = vmatprep.subr.bf16.mxu0 %v1304_v33 }
 0x5de   :  { %v831_v59 = vadd.f32 %v830_v58, %v829_v57  ;;  %v924_v57 = vrot.slane %v1579_v44, %v1481_v45 }
 0x5e0   :  { %v832_v60 = vrot.slane %v831_v59, 2  ;;  %1239 = vmatpush3.bf16.msra.mxu0 %v1304_v33 }
 0x5e2   :  { %v833_v61 = vadd.f32 %v832_v60, %v831_v59  ;;  %v900_v59 = vrot.slane %v1579_v44, %v899_v55 }
 0x5e3   :  { %1241 = vmatmul.mubr.bf16.vlgmr.msra.gmra.mrb[16].mxu0 %v1466_v62  ;;  %v891_v62 = vsub.s32 3, %v1374_v11 }
 0x5e4   :  { %v834_v0 = vrot.slane %v833_v61, 1 }
 0x5e6   :  { %v835_v1 = vadd.f32 %v834_v0, %v833_v61 }
 0x5e8   :  { %836 = vrot.lane.b32.xlu0 %v835_v1, %s1310_s0 }
 0x65a   :  { %v837_v2 = vpop.permute.xlu0 %836 }
 0x65b   :  { %v838_v3 = vadd.f32 %v837_v2, %v835_v1 }
 0x65d   :  { %839 = vrot.lane.b32.xlu1 %v838_v3, %s1311_s1 }
 0x6b6   :  { %v1242_v39 = vpop.f32.mrb[16].mxu0 }
 0x6b7   :  { %v1016_v2 = vadd.f32 %v1242_v39, %v924_v57 }
 0x6cf   :  { %v840_v4 = vpop.permute.xlu1 %839 }
 0x6d0   :  { %v841_v5 = vadd.f32 %v840_v4, %v838_v3 }
 0x6d2   :  { %842 = vrot.lane.b32.xlu0 %v841_v5, %s1312_s24 }
 0x744   :  { %v843_v6 = vpop.permute.xlu0 %842 }
 0x745   :  { %v844_v7 = vadd.f32 %v843_v6, %v841_v5 }
 0x747   :  { %845 = vrot.lane.b32.xlu1 %v844_v7, %s1313_s25 }
 0x7b9   :  { %v846_v8 = vpop.permute.xlu1 %845 }
 0x7ba   :  { %v847_v9 = vadd.f32 %v846_v8, %v844_v7 }
 0x7bc   :  { %v848_v10 = vmul.f32 0.001953125, %v847_v9 }
 0x7be   :  { %v852_v12 = vrot.slane %v848_v10, %v1481_v45 }
 0x7c0   :  { %v1615_v52 = vsub.f32 %v813_v36, %v852_v12  ;;  %v1617_v13 = vsub.f32 %v816_v41, %v852_v12  ;;  %v1619_v49 = vsub.f32 %v821_v54, %v852_v12  ;;  %v1621_v50 = vsub.f32 %v824_v56, %v852_v12  ;;  %v1007_v41 = vpop.f32.mrb[17].mxu0 }
 0x7c1   :  { %v1243_v63 = vpop.f32.mrb[18].mxu0  ;;  %v1008_v3 = vadd.f32 %v1007_v41, %v924_v57 }
 0x7c2   :  { %v857_v53 = vmul.f32 %v1615_v52, %v1615_v52  ;;  %v858_v14 = vmul.f32 %v1617_v13, %v1617_v13  ;;  %v859_v15 = vmul.f32 %v1619_v49, %v1619_v49  ;;  %v860_v17 = vmul.f32 %v1621_v50, %v1621_v50  ;;  %v1010_v42 = vpop.f32.mrb[19].mxu0 }
 0x7c3   :  { %v1019_v4 = vadd.f32 %v1243_v63, %v924_v57  ;;  %v1011_v11 = vadd.f32 %v1010_v42, %v924_v57 }
 0x7c4   :  { %v861_v16 = vadd.f32 %v858_v14, %v857_v53 }
 0x7c6   :  { %v862_v18 = vadd.f32 %v861_v16, %v859_v15 }
 0x7c8   :  { %v863_v19 = vadd.f32 %v862_v18, %v860_v17 }
 0x7ca   :  { %v864_v20 = vrot.slane %v863_v19, 4 }
 0x7cc   :  { %v865_v21 = vadd.f32 %v864_v20, %v863_v19 }
 0x7ce   :  { %v866_v22 = vrot.slane %v865_v21, 2 }
 0x7d0   :  { %v867_v23 = vadd.f32 %v866_v22, %v865_v21 }
 0x7d2   :  { %v868_v30 = vrot.slane %v867_v23, 1 }
 0x7d4   :  { %v869_v24 = vadd.f32 %v868_v30, %v867_v23 }
 0x7d6   :  { %870 = vrot.lane.b32.xlu0 %v869_v24, %s1310_s0 }
 0x848   :  { %v871_v27 = vpop.permute.xlu0 %870 }
 0x849   :  { %v872_v51 = vadd.f32 %v871_v27, %v869_v24 }
 0x84b   :  { %873 = vrot.lane.b32.xlu1 %v872_v51, %s1311_s1 }
 0x8bd   :  { %v874_v34 = vpop.permute.xlu1 %873 }
 0x8be   :  { %v875_v36 = vadd.f32 %v874_v34, %v872_v51 }
 0x8c0   :  { %876 = vrot.lane.b32.xlu0 %v875_v36, %s1312_s24 }
 0x932   :  { %v877_v37 = vpop.permute.xlu0 %876 }
 0x933   :  { %v878_v38 = vadd.f32 %v877_v37, %v875_v36 }
 0x935   :  { %879 = vrot.lane.b32.xlu1 %v878_v38, %s1313_s25 }
 0x9a7   :  { %v880_v43 = vpop.permute.xlu1 %879 }
 0x9a8   :  { %v881_v46 = vadd.f32 %v880_v43, %v878_v38 }
 0x9aa   :  { %v882_v47 = vmul.f32 0.001953125, %v881_v46 }
 0x9ac   :  { %v883_v48 = vadd.f32 1e-05, %v882_v47 }
 0x9ae   :  { %1307 = vrsqrt.f32 %v883_v48 }
 0x9b8   :  { %v1308_v54 = vpop.eup %1307 }
 0x9b9   :  { %v886_v40 = vrot.slane %v1308_v54, 5 }
 0x9bb   :  { %v888_v56 = vmul.f32 %v886_v40, %v1579_v44 }
 0x9bd   :  { %v892_v58 = vrot.slane %v888_v56, %v891_v62 }
 0x9bf   :  { %v895_v60 = vmul.f32 %v892_v58, %v1619_v49  ;;  %v893_v61 = vmul.f32 %v892_v58, %v1615_v52  ;;  %v896_v0 = vmul.f32 %v892_v58, %v1621_v50  ;;  %v894_v1 = vmul.f32 %v892_v58, %v1617_v13 }
 0x9c1   :  { %v903_v5 = vadd.f32 %v900_v59, %v895_v60  ;;  %v901_v6 = vadd.f32 %v900_v59, %v893_v61  ;;  %v904_v7 = vadd.f32 %v900_v59, %v896_v0  ;;  %v902_v8 = vadd.f32 %v900_v59, %v894_v1 }
 0x9c3   :  { %v1024_v45 = vadd.f32 %v1016_v2, %v903_v5  ;;  %v1022_v9 = vadd.f32 %v1008_v3, %v901_v6  ;;  %v1025_v10 = vadd.f32 %v1019_v4, %v904_v7  ;;  %v1023_v44 = vadd.f32 %v1011_v11, %v902_v8 }
 0x9c5   :  { %v1028_v12 = vmax.f32 %v1024_v45, 0.0  ;;  %v1026_v49 = vmax.f32 %v1022_v9, 0.0  ;;  %v1029_v53 = vmax.f32 %v1025_v10, 0.0  ;;  %v1027_v52 = vmax.f32 %v1023_v44, 0.0 }
 0x9c7   :  { %1032 = vst [vmem:[%s1687_s5 + $0x10] sm:$0xff] %v1028_v12  ;;  %1030 = vst [vmem:[%s1687_s5] sm:$0xff] %v1026_v49 }
 0x9c8   :  { %1033 = vst [vmem:[%s1687_s5 + $0x18] sm:$0xff] %v1029_v53  ;;  %1031 = vst [vmem:[%s1687_s5 + $0x8] sm:$0xff] %v1027_v52 }

</bundles_post_ra>
